<compile_context>
chip_gen: v5e
topology: v5e:2x2
jax: 0.10.0
libtpu: 0.0.40
codegen_flags: <defaults>
</compile_context>

<pallas_src>
import functools

import jax
import jax.numpy as jnp
from jax import lax
from jax.experimental import pallas as pl
from jax.experimental.pallas import tpu as pltpu

_LANE = 128
_SUBLANE = 8


def _round_up(n, m):
    return ((n + m - 1) // m) * m


def causal_attn_kernel(x_ref, w_ref, o_ref, *, d_out_real, d_pad):
    # x_ref: (T_p, d_in_p)   w_ref: (d_in_p, 3*d_pad)   o_ref: (T_p, d_pad)
    x = x_ref[...]
    w = w_ref[...]

    # Single fused QKV projection on the MXU (f32 in, f32 accumulate).
    qkv = jnp.dot(x, w, preferred_element_type=jnp.float32)          # (T_p, 3*d_pad)
    q = qkv[:, :d_pad]
    k = qkv[:, d_pad:2 * d_pad]
    v = qkv[:, 2 * d_pad:]

    # Fold the softmax scale (1/sqrt(d_out), d_out = REAL key width, not padded) into q.
    q = q * (1.0 / (d_out_real ** 0.5))

    # scores = q @ k^T without materializing k.T: contract last dims directly.
    scores = lax.dot_general(
        q, k, dimension_numbers=(((1,), (1,)), ((), ())),
        preferred_element_type=jnp.float32)                          # (T_p, T_p)

    t = scores.shape[0]
    row = lax.broadcasted_iota(jnp.int32, (t, t), 0)
    col = lax.broadcasted_iota(jnp.int32, (t, t), 1)
    # Causal mask (== torch.triu(ones, diagonal=1)); padded key rows are also masked
    # out for every real query row since their column index >= T > row index.
    scores = jnp.where(col > row, -jnp.inf, scores)

    # Numerically stable softmax; divide -> reciprocal multiply.
    m = jnp.max(scores, axis=-1, keepdims=True)
    e = jnp.exp(scores - m)
    denom = jnp.sum(e, axis=-1, keepdims=True)
    # approx=False keeps the exact f32 reciprocal (approx=True would loosen the 1e-5
    # match against the f32 reference).
    attn = e * pl.reciprocal(denom, approx=False)

    ctx = jnp.dot(attn, v, preferred_element_type=jnp.float32)       # (T_p, d_pad)
    o_ref[...] = ctx.astype(o_ref.dtype)


def causal_attention(x, wq, wk, wv):
    """x: (B, T, d_in) f32; wq/wk/wv: (d_in, d_out) f32 (i.e. nn.Linear weight^T)."""
    B, T, d_in = x.shape
    d_out = wq.shape[1]

    T_p = _round_up(T, _SUBLANE)
    d_in_p = _round_up(d_in, _LANE)
    d_out_p = _round_up(d_out, _LANE)

    # Zero-pad activations and pack the three projections into one lane-aligned weight
    # so the kernel does a single (T_p, d_in_p) x (d_in_p, 3*d_out_p) matmul.
    x_p = jnp.zeros((B, T_p, d_in_p), x.dtype).at[:, :T, :d_in].set(x)
    w_qkv = jnp.zeros((d_in_p, 3 * d_out_p), x.dtype)
    w_qkv = w_qkv.at[:d_in, 0 * d_out_p:0 * d_out_p + d_out].set(wq)
    w_qkv = w_qkv.at[:d_in, 1 * d_out_p:1 * d_out_p + d_out].set(wk)
    w_qkv = w_qkv.at[:d_in, 2 * d_out_p:2 * d_out_p + d_out].set(wv)

    kernel = functools.partial(causal_attn_kernel, d_out_real=d_out, d_pad=d_out_p)

    out_p = pl.pallas_call(
        kernel,
        out_shape=jax.ShapeDtypeStruct((B, T_p, d_out_p), jnp.float32),
        grid_spec=pltpu.PrefetchScalarGridSpec(
            num_scalar_prefetch=0,
            grid=(B,),
            in_specs=[
                pl.BlockSpec((pl.Squeezed(), T_p, d_in_p), lambda b: (b, 0, 0)),
                pl.BlockSpec((d_in_p, 3 * d_out_p), lambda b: (0, 0)),
            ],
            out_specs=pl.BlockSpec((pl.Squeezed(), T_p, d_out_p), lambda b: (b, 0, 0)),
        ),
        compiler_params=pltpu.CompilerParams(dimension_semantics=("parallel",)),
    )(x_p, w_qkv)

    return out_p[:, :T, :d_out]


def reference_attention(x, wq, wk, wv):
    q = x @ wq
    k = x @ wk
    v = x @ wv
    scores = jnp.einsum("btd,bsd->bts", q, k)
    T = x.shape[1]
    mask = jnp.triu(jnp.ones((T, T), dtype=bool), k=1)
    scores = jnp.where(mask[None], -jnp.inf, scores)
    w = jax.nn.softmax(scores / (k.shape[-1] ** 0.5), axis=-1)
    return jnp.einsum("bts,bsd->btd", w, v)


if __name__ == "__main__":
    # Inputs from the reference module: 6 tokens x 3 features, stacked to batch=2.
    inputs = jnp.array(
        [[0.43, 0.15, 0.89],
         [0.55, 0.87, 0.66],
         [0.57, 0.85, 0.64],
         [0.22, 0.58, 0.33],
         [0.77, 0.25, 0.10],
         [0.05, 0.80, 0.55]], dtype=jnp.float32)
    x = jnp.stack([inputs, inputs], axis=0)        # (2, 6, 3)

    d_in, d_out = 3, 2
    key = jax.random.PRNGKey(0)
    kq, kk, kv = jax.random.split(key, 3)
    bound = 1.0 / (d_in ** 0.5)                    # matches nn.Linear default init range
    # stored as (d_in, d_out), i.e. W.T relative to nn.Linear's (d_out, d_in)
    wq = jax.random.uniform(kq, (d_in, d_out), jnp.float32, -bound, bound)
    wk = jax.random.uniform(kk, (d_in, d_out), jnp.float32, -bound, bound)
    wv = jax.random.uniform(kv, (d_in, d_out), jnp.float32, -bound, bound)

    # Note: nn.Dropout is defined in __init__ but never applied in forward, so it is omitted.
    out = causal_attention(x, wq, wk, wv)
    out = jax.block_until_ready(out)

    ref = reference_attention(x, wq, wk, wv)
    assert out.shape == (2, 6, d_out)
    assert jnp.allclose(out, ref, atol=1e-5, rtol=1e-5), "mismatch vs reference"
    print("KERNEL_OK")
</pallas_src>

<mosaic_0001>
module attributes {stable_mosaic.version = 11 : i64} {
  func.func @causal_attn_kernel(%arg0: i32, %arg1: memref<1x8x128xf32, #tpu.memory_space<vmem>>, %arg2: memref<128x384xf32, #tpu.memory_space<vmem>>, %arg3: memref<1x8x128xf32, #tpu.memory_space<vmem>>) attributes {dimension_semantics = [#tpu.dimension_semantics<parallel>], iteration_bounds = array<i64: 2>, scalar_prefetch = 0 : i64, scratch_operands = 0 : i64, tpu.core_type = #tpu.core_type<tc>, window_params = [{transform_indices = @transform_0, window_bounds = array<i64: 1, 8, 128>}, {pipeline_mode = #tpu.pipeline_mode<synchronous>, transform_indices = @transform_1, window_bounds = array<i64: 128, 384>}, {transform_indices = @transform_2, window_bounds = array<i64: 1, 8, 128>}]} {
    %c0 = arith.constant 0 : index
    %c0_0 = arith.constant 0 : index
    %c0_1 = arith.constant 0 : index
    %0 = vector.load %arg1[%c0, %c0_0, %c0_1] : memref<1x8x128xf32, #tpu.memory_space<vmem>>, vector<1x8x128xf32>
    %1 = vector.shape_cast %0 : vector<1x8x128xf32> to vector<8x128xf32>
    %c0_2 = arith.constant 0 : index
    %c0_3 = arith.constant 0 : index
    %2 = vector.load %arg2[%c0_2, %c0_3] : memref<128x384xf32, #tpu.memory_space<vmem>>, vector<128x384xf32>
    %cst = arith.constant dense<0.000000e+00> : vector<8x384xf32>
    %3 = tpu.matmul %1, %2, %cst {dimension_numbers = #tpu.dot_dimension_numbers<[1], [0], [0], [1], [0, 0, 1, 1], [], []>} : vector<8x128xf32>, vector<128x384xf32>, vector<8x384xf32> -> vector<8x384xf32>
    %4 = vector.extract_strided_slice %3 {offsets = [0, 0], sizes = [8, 128], strides = [1, 1]} : vector<8x384xf32> to vector<8x128xf32>
    %5 = vector.extract_strided_slice %3 {offsets = [0, 128], sizes = [8, 128], strides = [1, 1]} : vector<8x384xf32> to vector<8x128xf32>
    %6 = vector.extract_strided_slice %3 {offsets = [0, 256], sizes = [8, 128], strides = [1, 1]} : vector<8x384xf32> to vector<8x128xf32>
    %cst_4 = arith.constant 0.707106769 : f32
    %7 = vector.broadcast %cst_4 : f32 to vector<8x128xf32>
    %8 = arith.mulf %4, %7 : vector<8x128xf32>
    %cst_5 = arith.constant dense<0.000000e+00> : vector<8x8xf32>
    %9 = tpu.matmul %8, %5, %cst_5 {dimension_numbers = #tpu.dot_dimension_numbers<[1], [1], [0], [0], [0, 0, 1, 0], [], []>} : vector<8x128xf32>, vector<8x128xf32>, vector<8x8xf32> -> vector<8x8xf32>
    %10 = tpu.iota {dimensions = array<i32: 0>} : vector<8x8xi32>
    %11 = tpu.iota {dimensions = array<i32: 1>} : vector<8x8xi32>
    %12 = arith.cmpi sgt, %11, %10 : vector<8x8xi32>
    %cst_6 = arith.constant 0xFF800000 : f32
    %13 = vector.broadcast %cst_6 : f32 to vector<8x8xf32>
    %14 = arith.select %12, %13, %9 : vector<8x8xi1>, vector<8x8xf32>
    %cst_7 = arith.constant dense<0xFF800000> : vector<8xf32>
    %15 = vector.multi_reduction <maximumf>, %14, %cst_7 [1] : vector<8x8xf32> to vector<8xf32>
    %16 = vector.shape_cast %15 : vector<8xf32> to vector<8x1xf32>
    %17 = vector.broadcast %16 : vector<8x1xf32> to vector<8x8xf32>
    %18 = arith.subf %14, %17 : vector<8x8xf32>
    %19 = math.exp %18 : vector<8x8xf32>
    %cst_8 = arith.constant dense<0.000000e+00> : vector<8xf32>
    %20 = vector.multi_reduction <add>, %19, %cst_8 [1] : vector<8x8xf32> to vector<8xf32>
    %21 = vector.shape_cast %20 : vector<8xf32> to vector<8x1xf32>
    %22 = tpu.reciprocal %21 : vector<8x1xf32> -> vector<8x1xf32>
    %23 = vector.broadcast %22 : vector<8x1xf32> to vector<8x8xf32>
    %24 = arith.mulf %19, %23 : vector<8x8xf32>
    %cst_9 = arith.constant dense<0.000000e+00> : vector<8x128xf32>
    %25 = tpu.matmul %24, %6, %cst_9 {dimension_numbers = #tpu.dot_dimension_numbers<[1], [0], [0], [1], [0, 0, 1, 1], [], []>} : vector<8x8xf32>, vector<8x128xf32>, vector<8x128xf32> -> vector<8x128xf32>
    %c0_10 = arith.constant 0 : index
    %c0_11 = arith.constant 0 : index
    %c0_12 = arith.constant 0 : index
    %26 = vector.load %arg3[%c0_10, %c0_11, %c0_12] : memref<1x8x128xf32, #tpu.memory_space<vmem>>, vector<1x8x128xf32>
    %27 = vector.shape_cast %26 : vector<1x8x128xf32> to vector<8x128xf32>
    %28 = vector.shape_cast %25 : vector<8x128xf32> to vector<1x8x128xf32>
    tpu.vector_store %arg3[%c0_10, %c0_11, %c0_12], %28 {strides = array<i32>} : memref<1x8x128xf32, #tpu.memory_space<vmem>>, vector<1x8x128xf32>,
    return
  }
  func.func @transform_0(%arg0: i32) -> (i32, i32, i32) {
    %c0_i32 = arith.constant 0 : i32
    %c0_i32_0 = arith.constant 0 : i32
    %c0_i32_1 = arith.constant 0 : i32
    return %arg0, %c0_i32, %c0_i32_0 : i32, i32, i32
  }
  func.func @transform_1(%arg0: i32) -> (i32, i32) {
    %c0_i32 = arith.constant 0 : i32
    %c0_i32_0 = arith.constant 0 : i32
    %c0_i32_1 = arith.constant 0 : i32
    return %c0_i32, %c0_i32_0 : i32, i32
  }
  func.func @transform_2(%arg0: i32) -> (i32, i32, i32) {
    %c0_i32 = arith.constant 0 : i32
    %c0_i32_0 = arith.constant 0 : i32
    %c0_i32_1 = arith.constant 0 : i32
    return %arg0, %c0_i32, %c0_i32_0 : i32, i32, i32
  }
}

</mosaic_0001>

<bundles_post_ra>
// kernel: tpu_custom_call.1
= control target key start
LH: loop header
LB: loop body
LE: loop exit
PB: predicated region body
PF: predicated region fallthrough
CT: control target
= control target key end

     0   :  { %7 = vsyncpa [#allocation3], 0  ;;  %s833_s0 = inlined_call_operand.hbm [shape: f32[2,8,128], index: 0, kind: input, shape index: {}]   ;;  %s834_s1 = inlined_call_operand.hbm [shape: f32[128,384], index: 1, kind: input, shape index: {}]   ;;  %s835_s2 = inlined_call_operand.hbm [shape: f32[2,8,128], index: 2, kind: output, shape index: {}]  }
   0x1   :  { %9 = vsyncpa [#allocation3 + $0x1], 0 }
   0x2   :  { %10 = vsyncpa [#allocation6], 0 }
   0x3   :  { %11 = vsyncpa [#allocation4], 0 }
   0x4   :  { %13 = vsyncpa [#allocation4 + $0x1], 0  ;;  %s687_s9 = smov 0   ;;  %s689_s10 = smov 0  }
   0x5   :  { %s691_s11 = smov 0   ;;  %s693_s12 = smov 0  }
   0x6 LB: > { %s108_s15 = sshll.u32 %s834_s1, 4  ;;  %s711_s16 = sadd.s32 4294967295, %s667_s12   ;;  %s667_s12 = sphi %s693_s12, %s845_s12   ;;  %s663_s11 = sphi %s691_s11, %s844_s11   ;;  %s659_s10 = sphi %s689_s10, %s843_s10   ;;  %s655_s9 = sphi %s687_s9, %s842_s9   ;;  %s109_s15 = int_to_ptr.hbm [resolvable:$true] %s108_s15 }
   0x7   : > { %p460_p0 = scmp.ge.s32.totalorder %s667_s12, 1  ;;  %p40_p1 = scmp.eq.s32.totalorder %s711_s16, 0 }
   0x8   : > { %p97_p2 = scmp.lt.s32.totalorder %s667_s12, 3  ;;  %s669_s18 = smov [#allocation5]  }
   0x9   : > { %s110_s19 = sshll.u32 %s669_s18, 4  ;;  %s670_s20 = smov 384   ;;  %s111_s19 = int_to_ptr.vmem [resolvable:$true] %s110_s19 }
   0xa   : > { %p716_p3 = pnand %p460_p0, %p97_p2  ;;  %s671_s21 = smov 24  }
   0xb   : > { %s459_s22 = sadd.s32 4294967294, %s667_s12   ;;  %s727_s23 = sadd.s32 1, %s667_s12  }
   0xc   : > { %p482_p4 = pneg %p716_p3  ;;  %s26_s24 = sadd.s32 1, %s663_s11 }
   0xd   : > { %s23_s25 = ssub.s32 %s667_s12, %s727_s23  ;;  %p33_p7 = scmp.ne.s32.totalorder %s663_s11, %s659_s10 }
   0xe   : > { %p483_p6 = pnand %p482_p4, %p40_p1  ;;  %p24_p8 = scmp.eq.s32.totalorder %s23_s25, 0 }
   0xf   : > { %p34_p9 = scmp.eq.s32.totalorder %s667_s12, 0  ;;  %p39_p10 = scmp.ne.s32.totalorder %s659_s10, %s655_s9 }
  0x10   : > { %485 = dma.hbm_to_vmem [thread:$0]  (!%p483_p6), %s109_s15, 6144, %s111_s19, [#allocation6], %s670_s20, %s670_s20, %s671_s21  }
  0x11   : > { %p84_p11 = scmp.eq.s32.totalorder %s711_s16, 1  ;;  %p743_p12 = por %p40_p1, %p39_p10 }
  0x12   : > { %s739_s26 = scalar_select %p24_p8, %s663_s11, %s26_s24  }
  0x13   : > { %p747_p13 = por %p84_p11, %p33_p7  ;;  %p90_p0 = scmp.eq.s32.totalorder %s459_s22, 1 }
  0x14   : > { %p35_p2 = por %p34_p9, %p33_p7  ;;  %s124_s29 = sand.u32 1, %s663_s11  }
  0x15   : > { %p752_p4 = por %p90_p0, %p39_p10  ;;  %p495_p6 = scmp.lt.s32.totalorder %s667_s12, 2 }
  0x16   : > { %s463_s3 = sshll.u32 %s124_s29, 3  ;;  %s464_s4 = sshll.u32 %s667_s12, 3 }
  0x17   : > { %s132_s7 = scalar_lea.hbm %s833_s0, %s464_s4  ;;  %s128_s13 = scalar_lea.vmem [#allocation2], %s463_s3 }
  0x18   : > { %s134_s8 = sshll.u32 %s132_s7, 4  ;;  %s136_s14 = sshll.u32 %s128_s13, 4  ;;  %s135_s8 = int_to_ptr.hbm [resolvable:$true] %s134_s8  ;;  %s137_s14 = int_to_ptr.vmem [resolvable:$true] %s136_s14 }
  0x19   : > { %p761_p8 = pnand %p495_p6, %p35_p2  ;;  %s125_s18 = scalar_lea.sflag [#allocation3], %s124_s29 }
  0x1a   : > { %s567_s19 = sshra.s32 %s135_s8, 4  ;;  %s574_s24 = scalar_lea.hbm %s833_s0, 16  ;;  %s568_s19 = int_to_ptr.hbm [resolvable:$true] %s567_s19 }
  0x1b   : > { %s569_s20 = scalar_lea.hbm %s568_s19, 8  ;;  %p571_p9 = pneg %p761_p8 }
  0x1c   : > { %p570_p7 = scmp.ne.s32.totalorder %s568_s19, %s569_s20  ;;  %p575_p0 = scmp.lt.s32.totalorder %s568_s19, %s833_s0 }
  0x1d   : > { %p576_p2 = scmp.lt.s32.totalorder %s574_s24, %s569_s20 }
  0x1e   : > { %p572_p10 = pnand %p571_p9, %p570_p7 }
  0x1f   : > { %p577_p6 = por %p576_p2, %p575_p0 }
  0x20   : > { %p573_p11 = pneg %p572_p10 }
  0x22   : > { %p578_p5 = pnand %p577_p6, %p573_p11 }
  0x24   : > { %581 = shalt.err (!%p578_p5)
}
  0x25   : > { %489 = dma.hbm_to_vmem [thread:$0]  (!%p761_p8), %s135_s8, 128, %s137_s14, %s125_s18  }
  0x26   : > { %145 = sbr.rel (%p716_p3) target bundleno = 739 (0x2e3), region = 28  ;;  %s778_s29 = sand.u32 (!%p716_p3), 1, %s659_s10  }
  0x27   : > { %s466_s4 = sshll.u32 (!%p716_p3), %s778_s29, 3  ;;  %s148_s5 = scalar_lea.sflag (!%p716_p3), [#allocation3], %s778_s29 }
  0x28   : > { %s784_s6 = scalar_lea.vmem (!%p716_p3), [#allocation2], %s466_s4 }
  0x2b   : > { %642 = dma.done.wait (%p743_p12), %s148_s5, 128  }
  0x2c   : > { %644 = vsyncadd (%p743_p12), %s148_s5, 4294967168 }
  0x2d   : > { %646 = dma.done.wait (%p40_p1), [#allocation6], 6144  }
  0x2e   : > { %648 = vsyncadd (%p40_p1), [#allocation6], 4294961152  ;;  %v225_v0 = vld [vmem:[#allocation5 + $0x170] sm:$0xff]  ;;  %v224_v1 = vld [vmem:[#allocation5 + $0x168] sm:$0xff]  ;;  %v308_v47 = vlaneseq  ;;  %vm314_vm1 = vcmask 64512   ;;  %s471_s17 = sshll.u32 %s711_s16, 3 }
  0x2f   : > { %v222_v2 = vld [vmem:[#allocation5 + $0x158] sm:$0xff]  ;;  %247 = vmatpush.msra.mxu1 %v225_v0  ;;  %227 = vmatpush.msra.mxu0 %v224_v1  ;;  %v221_v3 = vld [vmem:[#allocation5 + $0x150] sm:$0xff]  ;;  %v219_v4 = vld [vmem:[#allocation5 + $0x140] sm:$0xff]  ;;  %s374_s8 = scalar_lea.hbm %s835_s2, %s471_s17  ;;  %s177_s13 = scalar_lea.vmem [#allocation7], %s466_s4 }
  0x30   : > { %v218_v5 = vld [vmem:[#allocation5 + $0x138] sm:$0xff]  ;;  %v216_v6 = vld [vmem:[#allocation5 + $0x128] sm:$0xff]  ;;  %v215_v7 = vld [vmem:[#allocation5 + $0x120] sm:$0xff]  ;;  %v309_v49 = vshrl.u32 %v308_v47, 7  ;;  %v311_v50 = vand.u32 127, %v308_v47  ;;  %s376_s14 = sshll.u32 %s177_s13, 4  ;;  %s377_s14 = int_to_ptr.vmem [resolvable:$true] %s376_s14 }
  0x31   : > { %248 = vmatpush.msra.mxu1 %v222_v2  ;;  %228 = vmatpush.msra.mxu0 %v221_v3  ;;  %v213_v8 = vld [vmem:[#allocation5 + $0x110] sm:$0xff]  ;;  %v212_v9 = vld [vmem:[#allocation5 + $0x108] sm:$0xff]  ;;  %v210_v10 = vld [vmem:[#allocation5 + $0xf8] sm:$0xff]  ;;  %s378_s15 = sshll.u32 %s374_s8, 4  ;;  %s364_s18 = scalar_lea.sflag [#allocation4], %s778_s29  ;;  %s379_s15 = int_to_ptr.hbm [resolvable:$true] %s378_s15 }
  0x32   : > { %v209_v11 = vld [vmem:[#allocation5 + $0xf0] sm:$0xff]  ;;  %v207_v12 = vld [vmem:[#allocation5 + $0xe0] sm:$0xff]  ;;  %v206_v13 = vld [vmem:[#allocation5 + $0xd8] sm:$0xff]  ;;  %vm312_vm0 = vcmp.gt.s32.totalorder %v311_v50, %v309_v49  ;;  %s611_s19 = sshra.s32 %s379_s15, 4  ;;  %s617_s22 = scalar_lea.hbm %s835_s2, 16  ;;  %s612_s19 = int_to_ptr.hbm [resolvable:$true] %s611_s19 }
  0x33   : > { %249 = vmatpush.msra.mxu1 %v219_v4  ;;  %229 = vmatpush.msra.mxu0 %v218_v5  ;;  %v204_v14 = vld [vmem:[#allocation5 + $0xc8] sm:$0xff]  ;;  %v203_v15 = vld [vmem:[#allocation5 + $0xc0] sm:$0xff]  ;;  %v201_v16 = vld [vmem:[#allocation5 + $0xb0] sm:$0xff]  ;;  %s613_s20 = scalar_lea.hbm %s612_s19, 8  ;;  %p618_p12 = scmp.lt.s32.totalorder %s612_s19, %s835_s2 }
  0x34   : > { %v200_v17 = vld [vmem:[#allocation5 + $0xa8] sm:$0xff]  ;;  %v198_v18 = vld [vmem:[#allocation5 + $0x98] sm:$0xff]  ;;  %v197_v19 = vld [vmem:[#allocation5 + $0x90] sm:$0xff]  ;;  %p614_p1 = scmp.ne.s32.totalorder %s612_s19, %s613_s20  ;;  %p619_p8 = scmp.lt.s32.totalorder %s617_s22, %s613_s20 }
  0x35   : > { %250 = vmatpush.msra.mxu1 %v216_v6  ;;  %230 = vmatpush.msra.mxu0 %v215_v7  ;;  %v195_v20 = vld [vmem:[#allocation5 + $0x80] sm:$0xff]  ;;  %v194_v21 = vld [vmem:[#allocation5 + $0x78] sm:$0xff]  ;;  %v192_v22 = vld [vmem:[#allocation5 + $0x68] sm:$0xff] }
  0x36   : > { %v191_v23 = vld [vmem:[#allocation5 + $0x60] sm:$0xff]  ;;  %v189_v24 = vld [vmem:[#allocation5 + $0x50] sm:$0xff]  ;;  %v188_v25 = vld [vmem:[#allocation5 + $0x48] sm:$0xff]  ;;  %p615_p3 = pnand %p614_p1, %p747_p13  ;;  %p620_p7 = por %p619_p8, %p618_p12 }
  0x37   : > { %251 = vmatpush.msra.mxu1 %v213_v8  ;;  %231 = vmatpush.msra.mxu0 %v212_v9  ;;  %v186_v26 = vld [vmem:[#allocation5 + $0x38] sm:$0xff]  ;;  %v185_v27 = vld [vmem:[#allocation5 + $0x30] sm:$0xff]  ;;  %v183_v28 = vld [vmem:[#allocation5 + $0x20] sm:$0xff] }
  0x38   : > { %v182_v29 = vld [vmem:[#allocation5 + $0x18] sm:$0xff]  ;;  %v180_v30 = vld [vmem:[#allocation5 + $0x8] sm:$0xff]  ;;  %v179_v31 = vld [vmem:[#allocation5] sm:$0xff]  ;;  %p616_p5 = pneg %p615_p3 }
  0x39   : > { %252 = vmatpush.msra.mxu1 %v210_v10  ;;  %232 = vmatpush.msra.mxu0 %v209_v11  ;;  %v178_v32 = vld [vmem:[%s784_s6] sm:$0xff]  ;;  %v223_v37 = vld [vmem:[#allocation5 + $0x160] sm:$0xff]  ;;  %v220_v38 = vld [vmem:[#allocation5 + $0x148] sm:$0xff] }
  0x3a   : > { %v226_v36 = vld [vmem:[#allocation5 + $0x178] sm:$0xff]  ;;  %v217_v39 = vld [vmem:[#allocation5 + $0x130] sm:$0xff]  ;;  %v211_v41 = vld [vmem:[#allocation5 + $0x100] sm:$0xff]  ;;  %p621_p9 = pnand %p620_p7, %p616_p5 }
  0x3b   : > { %253 = vmatpush.msra.mxu1 %v207_v12  ;;  %233 = vmatpush.msra.mxu0 %v206_v13  ;;  %v214_v40 = vld [vmem:[#allocation5 + $0x118] sm:$0xff]  ;;  %v208_v42 = vld [vmem:[#allocation5 + $0xe8] sm:$0xff]  ;;  %v205_v43 = vld [vmem:[#allocation5 + $0xd0] sm:$0xff] }
  0x3c   : > { %267 = vmatpush.msra.mxu2 %v226_v36  ;;  %v202_v44 = vld [vmem:[#allocation5 + $0xb8] sm:$0xff]  ;;  %v199_v45 = vld [vmem:[#allocation5 + $0xa0] sm:$0xff]  ;;  %v196_v46 = vld [vmem:[#allocation5 + $0x88] sm:$0xff] }
  0x3d   : > { %254 = vmatpush.msra.mxu1 %v204_v14  ;;  %234 = vmatpush.msra.mxu0 %v203_v15  ;;  %v193_v48 = vld [vmem:[#allocation5 + $0x70] sm:$0xff]  ;;  %v190_v54 = vld [vmem:[#allocation5 + $0x58] sm:$0xff]  ;;  %v187_v55 = vld [vmem:[#allocation5 + $0x40] sm:$0xff] }
  0x3e   : > { %268 = vmatpush.msra.mxu2 %v223_v37  ;;  %v184_v56 = vld [vmem:[#allocation5 + $0x28] sm:$0xff]  ;;  %v181_v57 = vld [vmem:[#allocation5 + $0x10] sm:$0xff] }
  0x3f   : > { %255 = vmatpush.msra.mxu1 %v201_v16  ;;  %235 = vmatpush.msra.mxu0 %v200_v17 }
  0x40   : > { %269 = vmatpush.msra.mxu2 %v220_v38 }
  0x41   : > { %256 = vmatpush.msra.mxu1 %v198_v18  ;;  %236 = vmatpush.msra.mxu0 %v197_v19 }
  0x42   : > { %270 = vmatpush.msra.mxu2 %v217_v39 }
  0x43   : > { %257 = vmatpush.msra.mxu1 %v195_v20  ;;  %237 = vmatpush.msra.mxu0 %v194_v21 }
  0x44   : > { %271 = vmatpush.msra.mxu2 %v214_v40 }
  0x45   : > { %258 = vmatpush.msra.mxu1 %v192_v22  ;;  %238 = vmatpush.msra.mxu0 %v191_v23 }
  0x46   : > { %272 = vmatpush.msra.mxu2 %v211_v41 }
  0x47   : > { %259 = vmatpush.msra.mxu1 %v189_v24  ;;  %239 = vmatpush.msra.mxu0 %v188_v25 }
  0x48   : > { %273 = vmatpush.msra.mxu2 %v208_v42 }
  0x49   : > { %260 = vmatpush.msra.mxu1 %v186_v26  ;;  %240 = vmatpush.msra.mxu0 %v185_v27 }
  0x4a   : > { %274 = vmatpush.msra.mxu2 %v205_v43 }
  0x4b   : > { %261 = vmatpush.msra.mxu1 %v183_v28  ;;  %241 = vmatpush.msra.mxu0 %v182_v29 }
  0x4c   : > { %275 = vmatpush.msra.mxu2 %v202_v44 }
  0x4d   : > { %262 = vmatpush.msra.mxu1 %v180_v30  ;;  %242 = vmatpush.msra.mxu0 %v179_v31 }
  0x4e   : > { %263 = vmatmul.f32.vlgmr.msra.gmra.mxu1 %v178_v32  ;;  %243 = vmatmul.f32.vlgmr.msra.gmra.mxu0 %v178_v32 }
  0x4f   : > { %276 = vmatpush.msra.mxu2 %v199_v45 }
  0x51   : > { %277 = vmatpush.msra.mxu2 %v196_v46 }
  0x53   : > { %278 = vmatpush.msra.mxu2 %v193_v48 }
  0x55   : > { %279 = vmatpush.msra.mxu2 %v190_v54 }
  0x57   : > { %280 = vmatpush.msra.mxu2 %v187_v55 }
  0x59   : > { %281 = vmatpush.msra.mxu2 %v184_v56 }
  0x5b   : > { %282 = vmatpush.msra.mxu2 %v181_v57 }
  0x5c   : > { %283 = vmatmul.f32.vlgmr.msra.gmra.mxu2 %v178_v32 }
  0xcb   : > { %v264_v33 = vpop.f32.mrf.mxu1  ;;  %v244_v34 = vpop.f32.mrf.mxu0 }
  0xcc   : > { %v287_v35 = vmul.f32 0.70710677, %v244_v34  ;;  %303 = vmatpush.xpose.msra.mxu3 %v264_v33 }
  0xcf   : > { %304 = vmatmul.f32.vlgmr.msra.gmra.mxu3 %v287_v35 }
  0xdf   : > { %v284_v63 = vpop.f32.mrf.mxu2 }
  0xe0   : > { %357 = vmatpush.msrb.mxu3 %v284_v63 }
 0x152   : > { %v305_v51 = vpop.f32.mrf.mxu3 }
 0x153   : > { %v313_v52 = vsel %vm312_vm0, -inf, %v305_v51 }
 0x154   : > { %v315_v53 = vsel %vm314_vm1, %v313_v52, -inf }
 0x155   : > { %316 = vmax.xlane.f32.xlu0 %v315_v53 }
 0x1c8   : > { %v317_v58 = vpop.xlane.xlu0 %316 }
 0x1c9   : > { %v318_v59 = vsub.f32 %v313_v52, %v317_v58 }
 0x1cb   : > { %v319_v60 = vmul.f32 1.442695, %v318_v59 }
 0x1cd   : > { %533 = vpow2.f32 %v319_v60 }
 0x1d3   : > { %v534_v61 = vpop.eup %533 }
 0x1d4   : > { %v321_v62 = vsel %vm314_vm1, %v534_v61, 0.0 }
 0x1d5   : > { %322 = vadd.xlane.f32.xlu0 %v321_v62 }
 0x248   : > { %v323_v0 = vpop.xlane.xlu0 %322 }
 0x249   : > { %535 = vrcp.f32 %v323_v0  ;;  %v335_v4 = vand.u32 2147483648, %v323_v0  ;;  %v333_v6 = vand.u32 2147483647, %v323_v0  ;;  %vm329_vm3 = vweird.f32 %v323_v0 }
 0x24b   : > { %v336_v8 = vor.u32 1.1754944e-38, %v335_v4  ;;  %vm334_vm5 = vcmp.eq.f32.partialorder %v333_v6, 8.507059e+37 }
 0x24f   : > { %v536_v1 = vpop.eup %535 }
 0x250   : > { %v325_v2 = vmul.f32 %v536_v1, %v323_v0  ;;  %vm330_vm2 = vweird.f32 %v536_v1 }
 0x251   : > { %vm331_vm4 = vmor %vm329_vm3, %vm330_vm2 }
 0x252   : > { %v326_v3 = vsub.f32 1.0, %v325_v2 }
 0x254   : > { %v327_v5 = vmul.f32 %v536_v1, %v326_v3 }
 0x256   : > { %v328_v7 = vadd.f32 %v536_v1, %v327_v5 }
 0x258   : > { %v332_v9 = vsel %vm331_vm4, %v536_v1, %v328_v7 }
 0x259   : > { %v337_v10 = vsel %vm334_vm5, %v336_v8, %v332_v9 }
 0x25a   : > { %v338_v11 = vmul.f32 %v534_v61, %v337_v10 }
 0x25c   : > { %469 = vmatmul.msk.f32.vlgmr.msrb.gmra.mxu3 %vm314_vm1, %v338_v11 }
 0x2df   : > { %v359_v12 = vpop.f32.mrf.mxu3 }
 0x2e0   : > { %362 = vst [vmem:[%s177_s13] sm:$0xff] %v359_v12 }
 0x2e1   : > { %624 = shalt.err (!%p621_p9)
}
 0x2e2   : > { %480 = dma.vmem_to_hbm [thread:$0]  (%p747_p13), %s377_s14, 128, %s379_s15, %s364_s18  }
 0x2e3 PF: > { %s390_s3 = sand.u32 1, %s655_s9   ;;  %p841_p10 = scmp.ge.s32.totalorder %s667_s12, 2 }
 0x2e4   : > { %s391_s29 = scalar_lea.sflag [#allocation4], %s390_s3 }
 0x2e5   : > { %p491_p11 = pnand %p841_p10, %p752_p4 }
 0x2e7   : > { %p492_p0 = pneg %p491_p11 }
 0x2e9   : > { %650 = dma.done.wait (%p492_p0), %s391_s29, 128  }
 0x2ea   : > { %652 = vsyncadd (%p492_p0), %s391_s29, 4294967168  ;;  %p16_p2 = scmp.ge.s32.totalorder %s727_s23, 4   ;;  %s842_s9 = smov %s659_s10 }
 0x2eb   : > { %s843_s10 = smov %s663_s11  ;;  %s844_s11 = smov %s739_s26 }
 0x2ec   : > { %s845_s12 = smov %s727_s23  ;;  %18 = sbr.rel (!%p16_p2) target bundleno = 6 (0x6), region = 77 }
 0x2f1   :  { %397 = vsyncpa [#allocation3], 1 }
 0x2f2   :  { %399 = vsyncpa [#allocation3 + $0x1], 1 }
 0x2f3   :  { %400 = vsyncpa [#allocation6], 1 }
 0x2f4   :  { %401 = vsyncpa [#allocation4], 1 }
 0x2f5   :  { %403 = vsyncpa [#allocation4 + $0x1], 1 }

</bundles_post_ra>
